<compile_context>
chip_gen: v5e
topology: v5e:2x2
jax: 0.10.0
libtpu: 0.0.40
codegen_flags: <defaults>
</compile_context>

<pallas_src>
import functools

import jax
import jax.numpy as jnp
from jax.experimental import pallas as pl
from jax.experimental.pallas import tpu as pltpu

# GELU tanh-approx constants, folded: sqrt(2/pi) and sqrt(2/pi)*0.044715.
_C0 = 0.7978845608028654
_C1 = _C0 * 0.044715


def _gelu_tanh_f32(h):
    # 0.5*h*(1 + tanh(sqrt(2/pi)*(h + 0.044715*h^3))), inner polynomial folded.
    return 0.5 * h * (1.0 + jnp.tanh(h * (_C0 + _C1 * (h * h))))


# -----------------------------------------------------------------------------
# Kernels
# -----------------------------------------------------------------------------
def _mlp_kernel_resident(x_ref, w1_ref, b1_ref, w2_ref, b2_ref, o_ref):
    # Resident-weight path (whole 4E hidden dim in VMEM): no accumulator,
    # no read-modify-write on the output tile.
    h = jnp.dot(x_ref[...], w1_ref[...], preferred_element_type=jnp.float32)
    h = _gelu_tanh_f32(h + b1_ref[...])
    o_ref[...] = (
        jnp.dot(h.astype(w2_ref.dtype), w2_ref[...],
                preferred_element_type=jnp.float32)
        + b2_ref[...]
    ).astype(o_ref.dtype)


def _mlp_kernel_tiled(x_ref, w1_ref, b1_ref, w2_ref, b2_ref, o_ref, acc_ref):
    # Hidden-tiled path: reduction over the hidden (4E) axis with an f32
    # VMEM accumulator; the reduction grid axis is innermost.
    h_idx = pl.program_id(1)

    @pl.when(h_idx == 0)
    def _():
        acc_ref[...] = jnp.zeros_like(acc_ref)

    h = jnp.dot(x_ref[...], w1_ref[...], preferred_element_type=jnp.float32)
    h = _gelu_tanh_f32(h + b1_ref[...])
    acc_ref[...] += jnp.dot(h.astype(w2_ref.dtype), w2_ref[...],
                            preferred_element_type=jnp.float32)

    @pl.when(h_idx == pl.num_programs(1) - 1)
    def _():
        o_ref[...] = (acc_ref[...] + b2_ref[...]).astype(o_ref.dtype)


# -----------------------------------------------------------------------------
# Parameter prep (one-time, outside the hot path)
# -----------------------------------------------------------------------------
def prepare_mlp_params(w_fc, b_fc, w_proj, b_proj, compute_dtype=jnp.bfloat16):
    """torch.nn.Linear convention: w_fc (4E,E), b_fc (4E,), w_proj (E,4E), b_proj (E,).

    Returns matmul-layout (pre-transposed) weights in the MXU operand dtype
    and f32 row biases.
    """
    H, E = w_fc.shape
    w1 = jnp.asarray(w_fc.T, dtype=compute_dtype)     # (E, 4E)
    w2 = jnp.asarray(w_proj.T, dtype=compute_dtype)   # (4E, E)
    b1 = jnp.asarray(b_fc, dtype=jnp.float32).reshape(1, H)
    b2 = jnp.asarray(b_proj, dtype=jnp.float32).reshape(1, E)
    return w1, b1, w2, b2


# -----------------------------------------------------------------------------
# Tiling policy helpers
# -----------------------------------------------------------------------------
def _round_up(a, b):
    return ((a + b - 1) // b) * b


def _cdiv(a, b):
    return (a + b - 1) // b


@functools.lru_cache(maxsize=None)
def _tpu_info():
    """(vmem_capacity_bytes, is_v7, is_v5e) — perf policy only, not correctness."""
    vmem_cap = None
    try:
        vmem_cap = int(pltpu.get_tpu_info().vmem_capacity_bytes)
    except Exception:
        vmem_cap = None
    kind = ""
    try:
        kind = jax.devices()[0].device_kind.lower()
    except Exception:
        kind = ""
    is_v7 = ("v7" in kind) or ("7x" in kind)
    is_v5e = ("v5e" in kind) or ("v5 lite" in kind) or ("v5lite" in kind)
    if vmem_cap is None:
        if is_v7 or not kind:
            vmem_cap = 64 << 20      # conservative when unknown
        else:
            vmem_cap = 128 << 20     # v4/v5e/v5p/v6e parts
    if vmem_cap <= (64 << 20):
        is_v7 = True
    return vmem_cap, is_v7, is_v5e


def _vmem_bytes(tm, th, E, n_h, cd, od):
    """Scoped-VMEM bytes for one grid step (incl. activation temporaries)."""
    w_bufs = 1 if n_h == 1 else 2      # grid-invariant weights are single-buffered
    est = (
        2 * tm * E * cd                # x tile (double-buffered)
        + 2 * tm * E * od              # out tile (double-buffered)
        + w_bufs * E * th * cd         # w1 tile
        + w_bufs * th * E * cd         # w2 tile
        + w_bufs * th * 4              # b1 tile (f32)
        + E * 4                        # b2 (f32, single-buffered)
        + tm * th * 4                  # f32 matmul-1 result / GELU temp
        + tm * th * cd                 # bf16 cast of h for the 2nd matmul
    )
    if n_h > 1:
        est += tm * E * 4              # f32 accumulator scratch
    return est


def _th_candidates(H):
    divs = [d for d in range(H, 0, -1) if H % d == 0]
    m256 = [d for d in divs if d % 256 == 0]                    # MXU-aligned first
    m128 = [d for d in divs if d % 128 == 0 and d % 256 != 0]
    rest = [d for d in divs if d % 128 != 0]
    return m256 + m128 + rest


# -----------------------------------------------------------------------------
# Wrapper
# -----------------------------------------------------------------------------
@functools.partial(jax.jit, static_argnames=("tm", "th", "out_dtype"))
def mlp_pallas(x, w1, b1, w2, b2, *, tm=None, th=None, out_dtype=None):
    """Fused MLP forward. x: (B, T, E); params from prepare_mlp_params.

    tm: row tile (None = auto).  th: hidden tile (None = auto; H when weights
    fit the per-generation VMEM budget).  out_dtype: None = x.dtype (pass
    jnp.bfloat16 for bf16 models to halve output VMEM/HBM traffic).
    """
    B, T, E = x.shape
    H = w1.shape[1]
    M = B * T
    compute_dtype = w1.dtype
    out_dtype = x.dtype if out_dtype is None else jnp.dtype(out_dtype)
    cd = jnp.dtype(compute_dtype).itemsize
    od = jnp.dtype(out_dtype).itemsize

    vmem_cap, is_v7, is_v5e = _tpu_info()
    # Scoped-VMEM budget: ~104 MiB on 128-MiB parts, ~56 MiB on v7x (64 MiB).
    if vmem_cap >= (128 << 20):
        vmem_budget = 104 << 20
    else:
        vmem_budget = min(vmem_cap - (8 << 20), 56 << 20)

    # Row-tile defaults: resident weights need only a moderate tm; when weights
    # re-stream per row tile the arithmetic intensity is tm flops/byte, so the
    # tiled path wants tm >= 512 on v6e/v7x (256 suffices on v5e's slower MXU).
    tm_resident = 256 if tm is None else tm
    tm_tiled = (256 if is_v5e else 512) if tm is None else tm

    # ---- hidden tile (th) ----------------------------------------------------
    if th is not None:
        assert H % th == 0, "th must divide 4*E"
        th_eff = th
    else:
        tm_probe = max(16, min(tm_resident, _round_up(M, 16)))
        if _vmem_bytes(tm_probe, H, E, 1, cd, od) <= vmem_budget:
            th_eff = H                                   # fully resident weights
        else:
            tm_probe = max(16, min(tm_tiled, _round_up(M, 16)))
            th_eff = None
            for cand in _th_candidates(H):
                if cand == H:
                    continue
                if _vmem_bytes(tm_probe, cand, E, 2, cd, od) <= vmem_budget:
                    th_eff = cand
                    break
            if th_eff is None:                           # best effort
                aligned = [d for d in _th_candidates(H) if d % 128 == 0]
                th_eff = min(aligned) if aligned else 1
    n_h = H // th_eff

    # ---- row tile (tm) --------------------------------------------------------
    tm_eff = tm_resident if n_h == 1 else tm_tiled
    tm_eff = max(16, min(tm_eff, _round_up(M, 16)))      # 16-row bf16 packing
    # v7x has 2 TensorCores: ensure the "parallel" row axis has >= 2 tiles.
    while is_v7 and _cdiv(M, tm_eff) < 2 and tm_eff > 16:
        tm_eff = max(16, _round_up(tm_eff // 2, 16))
    Mp = _round_up(M, tm_eff)

    x2 = x.reshape(M, E).astype(compute_dtype)
    if Mp != M:
        x2 = jnp.pad(x2, ((0, Mp - M), (0, 0)))

    est = _vmem_bytes(tm_eff, th_eff, E, n_h, cd, od)
    vmem_limit = int(min(max(int(est * 1.25) + (2 << 20), 32 << 20), vmem_budget))

    if n_h == 1:
        out = pl.pallas_call(
            _mlp_kernel_resident,
            out_shape=jax.ShapeDtypeStruct((Mp, E), out_dtype),
            grid_spec=pltpu.PrefetchScalarGridSpec(
                num_scalar_prefetch=0,
                grid=(Mp // tm_eff,),
                in_specs=[
                    pl.BlockSpec((tm_eff, E), lambda i: (i, 0)),
                    pl.BlockSpec((E, H), lambda i: (0, 0),
                                 pipeline_mode=pl.Buffered(1)),
                    pl.BlockSpec((1, H), lambda i: (0, 0),
                                 pipeline_mode=pl.Buffered(1)),
                    pl.BlockSpec((H, E), lambda i: (0, 0),
                                 pipeline_mode=pl.Buffered(1)),
                    pl.BlockSpec((1, E), lambda i: (0, 0),
                                 pipeline_mode=pl.Buffered(1)),
                ],
                out_specs=pl.BlockSpec((tm_eff, E), lambda i: (i, 0)),
            ),
            compiler_params=pltpu.CompilerParams(
                dimension_semantics=("parallel",),
                vmem_limit_bytes=vmem_limit,
            ),
        )(x2, w1, b1, w2, b2)
    else:
        out = pl.pallas_call(
            _mlp_kernel_tiled,
            out_shape=jax.ShapeDtypeStruct((Mp, E), out_dtype),
            grid_spec=pltpu.PrefetchScalarGridSpec(
                num_scalar_prefetch=0,
                grid=(Mp // tm_eff, n_h),                # reduction axis innermost
                in_specs=[
                    pl.BlockSpec((tm_eff, E), lambda i, h: (i, 0)),
                    pl.BlockSpec((E, th_eff), lambda i, h: (0, h)),
                    pl.BlockSpec((1, th_eff), lambda i, h: (0, h)),
                    pl.BlockSpec((th_eff, E), lambda i, h: (h, 0)),
                    pl.BlockSpec((1, E), lambda i, h: (0, 0),
                                 pipeline_mode=pl.Buffered(1)),
                ],
                out_specs=pl.BlockSpec((tm_eff, E), lambda i, h: (i, 0)),
                scratch_shapes=[pltpu.VMEM((tm_eff, E), jnp.float32)],
            ),
            compiler_params=pltpu.CompilerParams(
                dimension_semantics=("parallel", "arbitrary"),
                vmem_limit_bytes=vmem_limit,
            ),
        )(x2, w1, b1, w2, b2)

    return out[:M].reshape(B, T, E)


# -----------------------------------------------------------------------------
# Reference + self-test
# -----------------------------------------------------------------------------
def _reference_mlp(x, w_fc, b_fc, w_proj, b_proj):
    h = x @ w_fc.T + b_fc
    h = 0.5 * h * (1.0 + jnp.tanh(_C0 * (h + 0.044715 * h ** 3)))
    return h @ w_proj.T + b_proj


def _make_params(key, E, H):
    k1, k2, k3, k4 = jax.random.split(key, 4)
    w_fc = jax.random.normal(k1, (H, E), dtype=jnp.float32) * 0.02
    b_fc = jax.random.normal(k2, (H,), dtype=jnp.float32) * 0.02
    w_proj = jax.random.normal(k3, (E, H), dtype=jnp.float32) * 0.02
    b_proj = jax.random.normal(k4, (E,), dtype=jnp.float32) * 0.02
    return w_fc, b_fc, w_proj, b_proj


if __name__ == "__main__":
    key = jax.random.PRNGKey(0)
    k_a, k_b, k_p1, k_p2 = jax.random.split(key, 4)

    # --- Config 1: toy GPTConfig sizes (N_EMBED=32, batch=2, seq=8) ----------
    # Auto policy picks the resident-weight path (no accumulator).
    B, T, E = 2, 8, 32
    H = 4 * E
    x = jax.random.normal(k_a, (B, T, E), dtype=jnp.float32)
    w_fc, b_fc, w_proj, b_proj = _make_params(k_p1, E, H)
    params = prepare_mlp_params(w_fc, b_fc, w_proj, b_proj)

    out = jax.block_until_ready(mlp_pallas(x, *params))
    ref = _reference_mlp(x, w_fc, b_fc, w_proj, b_proj)
    assert out.shape == (B, T, E)
    # bf16 operands (f32 accumulation) -> slightly looser tolerance vs f32 ref.
    assert jnp.allclose(out, ref, atol=2e-2, rtol=2e-2), "config-1 mismatch"

    # --- Config 2: exercise row padding + hidden-tiling (accumulator path) ---
    B2, T2, E2 = 3, 100, 128          # M=300 -> padded with tm=256
    H2 = 4 * E2                       # 512, tiled with th=256 -> 2 reduction steps
    x2 = jax.random.normal(k_b, (B2, T2, E2), dtype=jnp.float32)
    w_fc2, b_fc2, w_proj2, b_proj2 = _make_params(k_p2, E2, H2)
    params2 = prepare_mlp_params(w_fc2, b_fc2, w_proj2, b_proj2)

    out2 = jax.block_until_ready(mlp_pallas(x2, *params2, tm=256, th=256))
    ref2 = _reference_mlp(x2, w_fc2, b_fc2, w_proj2, b_proj2)
    assert out2.shape == (B2, T2, E2)
    assert jnp.allclose(out2, ref2, atol=2e-2, rtol=2e-2), "config-2 mismatch"

    print("KERNEL_OK")
</pallas_src>

<mosaic_0001>
module attributes {stable_mosaic.version = 11 : i64} {
  func.func @_mlp_kernel_resident(%arg0: i32, %arg1: memref<16x32xbf16, #tpu.memory_space<vmem>>, %arg2: memref<32x128xbf16, #tpu.memory_space<vmem>>, %arg3: memref<1x128xf32, #tpu.memory_space<vmem>>, %arg4: memref<128x32xbf16, #tpu.memory_space<vmem>>, %arg5: memref<1x32xf32, #tpu.memory_space<vmem>>, %arg6: memref<16x32xf32, #tpu.memory_space<vmem>>) attributes {dimension_semantics = [#tpu.dimension_semantics<parallel>], iteration_bounds = array<i64: 1>, scalar_prefetch = 0 : i64, scratch_operands = 0 : i64, tpu.core_type = #tpu.core_type<tc>, window_params = [{transform_indices = @transform_0, window_bounds = array<i64: 16, 32>}, {pipeline_mode = #tpu.pipeline_mode<synchronous>, transform_indices = @transform_1, window_bounds = array<i64: 32, 128>}, {pipeline_mode = #tpu.pipeline_mode<synchronous>, transform_indices = @transform_2, window_bounds = array<i64: 1, 128>}, {pipeline_mode = #tpu.pipeline_mode<synchronous>, transform_indices = @transform_3, window_bounds = array<i64: 128, 32>}, {pipeline_mode = #tpu.pipeline_mode<synchronous>, transform_indices = @transform_4, window_bounds = array<i64: 1, 32>}, {transform_indices = @transform_5, window_bounds = array<i64: 16, 32>}]} {
    %c0 = arith.constant 0 : index
    %c0_0 = arith.constant 0 : index
    %0 = vector.load %arg1[%c0, %c0_0] : memref<16x32xbf16, #tpu.memory_space<vmem>>, vector<16x32xbf16>
    %c0_1 = arith.constant 0 : index
    %c0_2 = arith.constant 0 : index
    %1 = vector.load %arg2[%c0_1, %c0_2] : memref<32x128xbf16, #tpu.memory_space<vmem>>, vector<32x128xbf16>
    %cst = arith.constant dense<0.000000e+00> : vector<16x128xf32>
    %2 = tpu.matmul %0, %1, %cst {dimension_numbers = #tpu.dot_dimension_numbers<[1], [0], [0], [1], [0, 0, 1, 1], [], []>} : vector<16x32xbf16>, vector<32x128xbf16>, vector<16x128xf32> -> vector<16x128xf32>
    %c0_3 = arith.constant 0 : index
    %c0_4 = arith.constant 0 : index
    %3 = vector.load %arg3[%c0_3, %c0_4] : memref<1x128xf32, #tpu.memory_space<vmem>>, vector<1x128xf32>
    %4 = vector.broadcast %3 : vector<1x128xf32> to vector<16x128xf32>
    %5 = arith.addf %2, %4 : vector<16x128xf32>
    %cst_5 = arith.constant 5.000000e-01 : f32
    %6 = vector.broadcast %cst_5 : f32 to vector<16x128xf32>
    %7 = arith.mulf %6, %5 : vector<16x128xf32>
    %8 = arith.mulf %5, %5 : vector<16x128xf32>
    %cst_6 = arith.constant 0.0356774069 : f32
    %9 = vector.broadcast %cst_6 : f32 to vector<16x128xf32>
    %10 = arith.mulf %9, %8 : vector<16x128xf32>
    %cst_7 = arith.constant 0.797884583 : f32
    %11 = vector.broadcast %cst_7 : f32 to vector<16x128xf32>
    %12 = arith.addf %11, %10 : vector<16x128xf32>
    %13 = arith.mulf %5, %12 : vector<16x128xf32>
    %14 = math.tanh %13 : vector<16x128xf32>
    %cst_8 = arith.constant 1.000000e+00 : f32
    %15 = vector.broadcast %cst_8 : f32 to vector<16x128xf32>
    %16 = arith.addf %15, %14 : vector<16x128xf32>
    %17 = arith.mulf %7, %16 : vector<16x128xf32>
    %18 = arith.truncf %17 : vector<16x128xf32> to vector<16x128xbf16>
    %c0_9 = arith.constant 0 : index
    %c0_10 = arith.constant 0 : index
    %19 = vector.load %arg4[%c0_9, %c0_10] : memref<128x32xbf16, #tpu.memory_space<vmem>>, vector<128x32xbf16>
    %cst_11 = arith.constant dense<0.000000e+00> : vector<16x32xf32>
    %20 = tpu.matmul %18, %19, %cst_11 {dimension_numbers = #tpu.dot_dimension_numbers<[1], [0], [0], [1], [0, 0, 1, 1], [], []>} : vector<16x128xbf16>, vector<128x32xbf16>, vector<16x32xf32> -> vector<16x32xf32>
    %c0_12 = arith.constant 0 : index
    %c0_13 = arith.constant 0 : index
    %21 = vector.load %arg5[%c0_12, %c0_13] : memref<1x32xf32, #tpu.memory_space<vmem>>, vector<1x32xf32>
    %22 = vector.broadcast %21 : vector<1x32xf32> to vector<16x32xf32>
    %23 = arith.addf %20, %22 : vector<16x32xf32>
    %c0_14 = arith.constant 0 : index
    %c0_15 = arith.constant 0 : index
    %24 = vector.load %arg6[%c0_14, %c0_15] : memref<16x32xf32, #tpu.memory_space<vmem>>, vector<16x32xf32>
    tpu.vector_store %arg6[%c0_14, %c0_15], %23 {strides = array<i32>} : memref<16x32xf32, #tpu.memory_space<vmem>>, vector<16x32xf32>,
    return
  }
  func.func @transform_0(%arg0: i32) -> (i32, i32) {
    %c0_i32 = arith.constant 0 : i32
    %c0_i32_0 = arith.constant 0 : i32
    return %arg0, %c0_i32 : i32, i32
  }
  func.func @transform_1(%arg0: i32) -> (i32, i32) {
    %c0_i32 = arith.constant 0 : i32
    %c0_i32_0 = arith.constant 0 : i32
    %c0_i32_1 = arith.constant 0 : i32
    return %c0_i32, %c0_i32_0 : i32, i32
  }
  func.func @transform_2(%arg0: i32) -> (i32, i32) {
    %c0_i32 = arith.constant 0 : i32
    %c0_i32_0 = arith.constant 0 : i32
    %c0_i32_1 = arith.constant 0 : i32
    return %c0_i32, %c0_i32_0 : i32, i32
  }
  func.func @transform_3(%arg0: i32) -> (i32, i32) {
    %c0_i32 = arith.constant 0 : i32
    %c0_i32_0 = arith.constant 0 : i32
    %c0_i32_1 = arith.constant 0 : i32
    return %c0_i32, %c0_i32_0 : i32, i32
  }
  func.func @transform_4(%arg0: i32) -> (i32, i32) {
    %c0_i32 = arith.constant 0 : i32
    %c0_i32_0 = arith.constant 0 : i32
    %c0_i32_1 = arith.constant 0 : i32
    return %c0_i32, %c0_i32_0 : i32, i32
  }
  func.func @transform_5(%arg0: i32) -> (i32, i32) {
    %c0_i32 = arith.constant 0 : i32
    %c0_i32_0 = arith.constant 0 : i32
    return %arg0, %c0_i32 : i32, i32
  }
}

</mosaic_0001>

<bundles_post_ra>
// kernel: mlp_pallas.1
= control target key start
LH: loop header
LB: loop body
LE: loop exit
PB: predicated region body
PF: predicated region fallthrough
CT: control target
= control target key end

     0   :  { %s355_s0 = inlined_call_operand.vmem [shape: bf16[16,32], index: 0, kind: input, shape index: {}]   ;;  %s356_s1 = inlined_call_operand.vmem [shape: bf16[32,128], index: 1, kind: input, shape index: {}]   ;;  %s357_s2 = inlined_call_operand.vmem [shape: f32[1,128], index: 2, kind: input, shape index: {}]   ;;  %s358_s3 = inlined_call_operand.vmem [shape: bf16[128,32], index: 3, kind: input, shape index: {}]   ;;  %s359_s4 = inlined_call_operand.vmem [shape: f32[1,32], index: 4, kind: input, shape index: {}]   ;;  %s360_s5 = inlined_call_operand.hbm [shape: f32[16,32], index: 5, kind: output, shape index: {}]  }
   0x1   :  { %v233_v0 = vld [vmem:[%s356_s1 + $0x8] sm:$0xff]  ;;  %v232_v1 = vld [vmem:[%s356_s1] sm:$0xff] }
   0x2   :  { %59 = vmatpush.bf16.msra.mxu0 %v233_v0 }
   0x3   :  { %10 = vsyncpa [#allocation3], 0  ;;  %v231_v2 = vld [vmem:[%s355_s0] sm:$0xff]  ;;  %vm49_vm0 = vcmask 261120   ;;  %v241_v3 = vld [vmem:[%s358_s3 + $0x38] sm:$0xff]  ;;  %s277_s15 = smov [#allocation2]  }
   0x4   :  { %152 = vmatpush.bf16.msra.mxu1 %v241_v3  ;;  %v240_v4 = vld [vmem:[%s358_s3 + $0x30] sm:$0xff]  ;;  %v239_v5 = vld [vmem:[%s358_s3 + $0x28] sm:$0xff]  ;;  %v238_v6 = vld [vmem:[%s358_s3 + $0x20] sm:$0xff]  ;;  %s172_s16 = sshll.u32 %s277_s15, 4  ;;  %s174_s19 = sshll.u32 %s360_s5, 4  ;;  %s173_s16 = int_to_ptr.vmem [resolvable:$true] %s172_s16  ;;  %s175_s19 = int_to_ptr.hbm [resolvable:$true] %s174_s19 }
   0x5   :  { %v237_v7 = vld [vmem:[%s358_s3 + $0x18] sm:$0xff]  ;;  %v236_v8 = vld [vmem:[%s358_s3 + $0x10] sm:$0xff]  ;;  %v235_v9 = vld [vmem:[%s358_s3 + $0x8] sm:$0xff]  ;;  %s278_s20 = smov 128   ;;  %s279_s21 = smov 8  }
   0x6   :  { %60 = vmatpush.bf16.msra.mxu0 %v232_v1  ;;  %v234_v10 = vld [vmem:[%s358_s3] sm:$0xff] }
   0x7   :  { %v245_v11 = vld [vmem:[%s357_s2] ss:$0 sm:$0xff] }
   0x8   :  { %153 = vmatpush.bf16.msra.mxu1 %v240_v4  ;;  %v246_v33 = vld [vmem:[%s359_s4] ss:$0 sm:$0xff] }
   0x9   :  { %198 = vmatmul.msk.bf16.vlgmr.msra.gmra.mxu0 %vm49_vm0, %v231_v2 }
   0xc   :  { %154 = vmatpush.bf16.msra.mxu1 %v239_v5 }
  0x10   :  { %155 = vmatpush.bf16.msra.mxu1 %v238_v6 }
  0x14   :  { %156 = vmatpush.bf16.msra.mxu1 %v237_v7 }
  0x18   :  { %157 = vmatpush.bf16.msra.mxu1 %v236_v8 }
  0x1c   :  { %158 = vmatpush.bf16.msra.mxu1 %v235_v9 }
  0x20   :  { %159 = vmatpush.bf16.msra.mxu1 %v234_v10 }
  0x86   :  { %v62_v12 = vpop.f32.mrf.mxu0 }
  0x87   :  { %v63_v13 = vadd.f32 %v245_v11, %v62_v12 }
  0x89   :  { %v69_v14 = vmul.f32 %v63_v13, %v63_v13  ;;  %v67_v27 = vmul.f32 0.5, %v63_v13 }
  0x8b   :  { %v71_v15 = vmul.f32 0.035677407, %v69_v14 }
  0x8d   :  { %v73_v16 = vadd.f32 0.7978846, %v71_v15 }
  0x8e   :  { %v64_v17 = vpop.f32.mrf.mxu0 }
  0x8f   :  { %v65_v18 = vadd.f32 %v245_v11, %v64_v17  ;;  %v75_v19 = vmul.f32 %v73_v16, %v63_v13 }
  0x91   :  { %v70_v20 = vmul.f32 %v65_v18, %v65_v18  ;;  %247 = vtanh.f32 %v75_v19  ;;  %v68_v28 = vmul.f32 0.5, %v65_v18 }
  0x93   :  { %v72_v21 = vmul.f32 0.035677407, %v70_v20 }
  0x95   :  { %v74_v22 = vadd.f32 0.7978846, %v72_v21 }
  0x97   :  { %v76_v23 = vmul.f32 %v74_v22, %v65_v18  ;;  %v248_v24 = vpop.eup %247 }
  0x98   :  { %v79_v25 = vadd.f32 1.0, %v248_v24 }
  0x99   :  { %249 = vtanh.f32 %v76_v23 }
  0x9a   :  { %v81_v30 = vmul.f32 %v79_v25, %v67_v27 }
  0x9f   :  { %v250_v26 = vpop.eup %249 }
  0xa0   :  { %v80_v29 = vadd.f32 1.0, %v250_v26 }
  0xa2   :  { %v82_v31 = vmul.f32 %v80_v29, %v68_v28 }
  0xa4   :  { %v83_v32 = vpack.c.bf16 %v82_v31, %v81_v30 }
  0xa6   :  { %160 = vmatmul.bf16.vlgmr.msra.gmra.mxu1 %v83_v32 }
 0x123   :  { %v161_v34 = vpop.f32.mrf.mxu1 }
 0x124   :  { %v162_v35 = vadd.f32 %v246_v33, %v161_v34 }
 0x126   :  { %166 = vst.msk [vmem:[#allocation2] sm:$0xff] %vm49_vm0, %v162_v35 }
 0x12b   :  { %v163_v36 = vpop.f32.mrf.mxu1 }
 0x12c   :  { %v164_v37 = vadd.f32 %v246_v33, %v163_v36 }
 0x12e   :  { %167 = vst.msk [vmem:[#allocation2 + $0x8] sm:$0xff] %vm49_vm0, %v164_v37 }
 0x12f   :  { %180 = dma.vmem_to_hbm [thread:$0]  %s173_s16, 256, %s175_s19, [#allocation3], %s278_s20, %s278_s20, %s279_s21  }
 0x130   :  { %275 = dma.done.wait [#allocation3], 256  }
 0x131   :  { %276 = vsyncadd [#allocation3], 4294967040 }
 0x132   :  { %185 = vsyncpa [#allocation3], 1 }

</bundles_post_ra>
